<compile_context>
chip_gen: v5e
topology: v5e:2x2
jax: 0.10.0
libtpu: 0.0.40
codegen_flags: <defaults>
</compile_context>

<pallas_src>
import functools

import jax
import jax.numpy as jnp
from jax.experimental import pallas as pl
from jax.experimental.pallas import tpu as pltpu


def _attention_kernel(x_ref, ms_ref, ps_ref, b_ref, o_ref, *,
                      batch, heads, dim, compute_dtype):
    """Single invocation: all batch elements and heads.

    x_ref  : (B, N, dim)      activations, f32 (cast to compute_dtype in-kernel)
    ms_ref : (H*dim, dim)     row-stacked M_h = scale * Wq_h^T Wk_h
    ps_ref : (H*dim, dim)     row-stacked P_h^T = Wo_h Wv_h
    b_ref  : (1, dim)         to_out bias (f32)
    o_ref  : (B, N, dim)      output (f32)
    """
    ms = ms_ref[...]                                   # resident weights
    ps = ps_ref[...]
    bias = b_ref[...]                                  # (1, dim) f32

    for b in range(batch):                             # B is tiny & static -> unrolled
        xb = x_ref[b].astype(compute_dtype)            # (N, dim)  cast on the VPU

        # One fused dot per product-matrix: rows [h*dim:(h+1)*dim] of `a` hold
        # M_h @ x_b^T (dim, N); likewise `c` holds P_h^T @ x_b^T = (x_b P_h)^T.
        a = jax.lax.dot_general(ms, xb, (((1,), (1,)), ((), ())),
                                preferred_element_type=jnp.float32)   # (H*dim, N)
        c = jax.lax.dot_general(ps, xb, (((1,), (1,)), ((), ())),
                                preferred_element_type=jnp.float32)   # (H*dim, N)
        a = a.astype(compute_dtype)                    # single cast each
        c = c.astype(compute_dtype)

        out_b = None
        for h in range(heads):                         # only dots + softmax inside
            ah = a[h * dim:(h + 1) * dim, :]           # (dim, N) sublane-aligned slice
            # scores_h = x_b M_h x_b^T   (softmax scale already folded into M_h)
            s = jnp.dot(xb, ah, preferred_element_type=jnp.float32)   # (N, N) f32

            # Numerically stable softmax, entirely in f32.
            s = s - jnp.max(s, axis=-1, keepdims=True)
            e = jnp.exp(s)
            l = jnp.sum(e, axis=-1, keepdims=True)
            r = pl.reciprocal(l, approx=True)          # EUP slot
            r = r * (2.0 - l * r)                      # one Newton step -> ~f32 exact
            attn = (e * r).astype(compute_dtype)
            # TODO(synk): no train-mode dropout (module default p=0.0 / eval).

            ch = c[h * dim:(h + 1) * dim, :]           # (dim, N) sublane-aligned slice
            # attn_h @ (x_b P_h)  == attn @ ch^T : contract last dims.
            contrib = jax.lax.dot_general(attn, ch, (((1,), (1,)), ((), ())),
                                          preferred_element_type=jnp.float32)  # (N, dim)
            out_b = contrib if out_b is None else out_b + contrib

        o_ref[b] = (out_b + bias).astype(o_ref.dtype)


def prepare_params(w_qkv, w_out, b_out, *, heads, dim_head,
                   compute_dtype=jnp.bfloat16):
    """One-time weight prep (weights are static across calls).

    w_qkv : (3*H*dh, dim)  PyTorch to_qkv weight.  Row r -> head r // (3*dh),
            j = r % (3*dh); j<dh -> q, dh<=j<2dh -> k, else v — this is exactly
            the module's  view(..., H, 3*dh).transpose(-3,-2).chunk(3, dim=-1).
    w_out : (dim, H*dh)    PyTorch to_out weight;  b_out : (dim,).

    Returns row-stacked product matrices (scale folded into M in f32 before the
    compute_dtype cast) so the kernel never has to slice lanes / concat heads:
        ms[h*dim:(h+1)*dim] = scale * Wq_h^T @ Wk_h
        ps[h*dim:(h+1)*dim] = Wo_h @ Wv_h        (= P_h^T with P_h = Wv_h^T Wo_h^T)
    """
    w_qkv = jnp.asarray(w_qkv, jnp.float32)
    w_out = jnp.asarray(w_out, jnp.float32)
    inner = heads * dim_head
    dim = w_qkv.shape[1]
    assert w_qkv.shape == (3 * inner, dim)
    assert w_out.shape == (dim, inner)
    scale = dim_head ** (-0.5)

    w3 = w_qkv.reshape(heads, 3, dim_head, dim)        # per-head interleaved layout
    wq, wk, wv = w3[:, 0], w3[:, 1], w3[:, 2]          # (H, dh, dim) each
    wo = jnp.transpose(w_out.reshape(dim, heads, dim_head), (1, 0, 2))  # (H, dim, dh)

    # M_h[d,e] = scale * sum_c Wq_h[c,d] * Wk_h[c,e]
    ms = jnp.einsum('hcd,hce->hde', wq, wk) * scale    # (H, dim, dim), f32
    # P_h^T[d,e] = sum_c Wo_h[d,c] * Wv_h[c,e]
    ps = jnp.einsum('hdc,hce->hde', wo, wv)            # (H, dim, dim), f32

    ms = ms.reshape(heads * dim, dim).astype(compute_dtype)
    ps = ps.reshape(heads * dim, dim).astype(compute_dtype)
    bias = jnp.asarray(b_out, jnp.float32).reshape(1, dim)
    return ms, ps, bias


def attention_forward(x, ms, ps, bias, *, heads, compute_dtype=jnp.bfloat16):
    """x: (B, N, dim) f32; ms/ps/bias from prepare_params()."""
    B, N, dim = x.shape
    assert ms.shape == (heads * dim, dim)
    assert ps.shape == (heads * dim, dim)

    kernel = functools.partial(_attention_kernel, batch=B, heads=heads,
                               dim=dim, compute_dtype=compute_dtype)

    return pl.pallas_call(
        kernel,
        out_shape=jax.ShapeDtypeStruct((B, N, dim), jnp.float32),
        grid_spec=pltpu.PrefetchScalarGridSpec(
            num_scalar_prefetch=0,
            grid=(1,),                                 # single step: batch folded in
            in_specs=[
                pl.BlockSpec((B, N, dim), lambda i: (0, 0, 0)),          # x (f32)
                pl.BlockSpec((heads * dim, dim), lambda i: (0, 0)),      # ms (resident)
                pl.BlockSpec((heads * dim, dim), lambda i: (0, 0)),      # ps (resident)
                pl.BlockSpec((1, dim), lambda i: (0, 0)),                # bias
            ],
            out_specs=pl.BlockSpec((B, N, dim), lambda i: (0, 0, 0)),
        ),
        compiler_params=pltpu.CompilerParams(
            dimension_semantics=("arbitrary",)),
    )(x, ms, ps, bias)


def attention_reference(x, w_qkv, w_out, b_out, *, heads, dim_head):
    """Pure-JAX f32 reference mirroring the PyTorch forward exactly."""
    B, N, dim = x.shape
    scale = dim_head ** (-0.5)
    qkv = x @ w_qkv.T                                  # (B, N, 3*inner)
    qkv = qkv.reshape(B, N, heads, 3 * dim_head)
    qkv = jnp.transpose(qkv, (0, 2, 1, 3))             # (B, H, N, 3*dh)
    q, k, v = jnp.split(qkv, 3, axis=-1)
    dots = jnp.einsum('bhnd,bhmd->bhnm', q, k) * scale
    attn = jax.nn.softmax(dots, axis=-1)
    out = jnp.einsum('bhnm,bhmd->bhnd', attn, v)
    out = jnp.transpose(out, (0, 2, 1, 3)).reshape(B, N, heads * dim_head)
    return out @ w_out.T + b_out


if __name__ == "__main__":
    B, N, dim = 2, 8, 32
    heads, dim_head = 4, 16
    inner_dim = heads * dim_head

    key = jax.random.PRNGKey(0)
    kx, kw1, kw2, kb = jax.random.split(key, 4)

    x = jax.random.normal(kx, (B, N, dim), dtype=jnp.float32)
    # Deterministic synthetic parameters (shapes follow the PyTorch module).
    w_qkv = jax.random.normal(kw1, (3 * inner_dim, dim), dtype=jnp.float32) * 0.05
    w_out = jax.random.normal(kw2, (dim, inner_dim), dtype=jnp.float32) * 0.05
    b_out = jax.random.normal(kb, (dim,), dtype=jnp.float32) * 0.05

    ref = attention_reference(x, w_qkv, w_out, b_out,
                              heads=heads, dim_head=dim_head)

    # Fast path: bf16 MXU operands (v6e/v7x native), f32 accumulation + softmax.
    ms, ps, bias = prepare_params(w_qkv, w_out, b_out, heads=heads,
                                  dim_head=dim_head, compute_dtype=jnp.bfloat16)
    out_bf16 = attention_forward(x, ms, ps, bias, heads=heads,
                                 compute_dtype=jnp.bfloat16)
    out_bf16 = jax.block_until_ready(out_bf16)
    assert jnp.allclose(out_bf16, ref, atol=3e-2, rtol=3e-2), \
        "bf16 kernel mismatch vs reference"

    # Full-f32 path for a tight numerical check (same kernel, f32 operands).
    ms32, ps32, bias32 = prepare_params(w_qkv, w_out, b_out, heads=heads,
                                        dim_head=dim_head,
                                        compute_dtype=jnp.float32)
    out_f32 = attention_forward(x, ms32, ps32, bias32, heads=heads,
                                compute_dtype=jnp.float32)
    out_f32 = jax.block_until_ready(out_f32)
    assert jnp.allclose(out_f32, ref, atol=1e-4, rtol=1e-4), \
        "f32 kernel mismatch vs reference"

    print("KERNEL_OK")
</pallas_src>

<mosaic_0001>
module attributes {stable_mosaic.version = 11 : i64} {
  func.func @_attention_kernel(%arg0: i32, %arg1: memref<2x8x32xf32, #tpu.memory_space<vmem>>, %arg2: memref<128x32xbf16, #tpu.memory_space<vmem>>, %arg3: memref<128x32xbf16, #tpu.memory_space<vmem>>, %arg4: memref<1x32xf32, #tpu.memory_space<vmem>>, %arg5: memref<2x8x32xf32, #tpu.memory_space<vmem>>) attributes {dimension_semantics = [#tpu.dimension_semantics<arbitrary>], iteration_bounds = array<i64: 1>, scalar_prefetch = 0 : i64, scratch_operands = 0 : i64, tpu.core_type = #tpu.core_type<tc>, window_params = [{pipeline_mode = #tpu.pipeline_mode<synchronous>, transform_indices = @transform_0, window_bounds = array<i64: 2, 8, 32>}, {pipeline_mode = #tpu.pipeline_mode<synchronous>, transform_indices = @transform_1, window_bounds = array<i64: 128, 32>}, {pipeline_mode = #tpu.pipeline_mode<synchronous>, transform_indices = @transform_2, window_bounds = array<i64: 128, 32>}, {pipeline_mode = #tpu.pipeline_mode<synchronous>, transform_indices = @transform_3, window_bounds = array<i64: 1, 32>}, {pipeline_mode = #tpu.pipeline_mode<synchronous>, transform_indices = @transform_4, window_bounds = array<i64: 2, 8, 32>}]} {
    %c0 = arith.constant 0 : index
    %c0_0 = arith.constant 0 : index
    %0 = vector.load %arg2[%c0, %c0_0] : memref<128x32xbf16, #tpu.memory_space<vmem>>, vector<128x32xbf16>
    %c0_1 = arith.constant 0 : index
    %c0_2 = arith.constant 0 : index
    %1 = vector.load %arg3[%c0_1, %c0_2] : memref<128x32xbf16, #tpu.memory_space<vmem>>, vector<128x32xbf16>
    %c0_3 = arith.constant 0 : index
    %c0_4 = arith.constant 0 : index
    %2 = vector.load %arg4[%c0_3, %c0_4] : memref<1x32xf32, #tpu.memory_space<vmem>>, vector<1x32xf32>
    %c0_5 = arith.constant 0 : index
    %c0_6 = arith.constant 0 : index
    %c0_7 = arith.constant 0 : index
    %3 = vector.load %arg1[%c0_5, %c0_6, %c0_7] : memref<2x8x32xf32, #tpu.memory_space<vmem>>, vector<1x8x32xf32>
    %4 = vector.shape_cast %3 : vector<1x8x32xf32> to vector<8x32xf32>
    %5 = arith.truncf %4 : vector<8x32xf32> to vector<8x32xbf16>
    %cst = arith.constant dense<0.000000e+00> : vector<128x8xf32>
    %6 = tpu.matmul %0, %5, %cst {dimension_numbers = #tpu.dot_dimension_numbers<[1], [1], [0], [0], [0, 0, 1, 0], [], []>} : vector<128x32xbf16>, vector<8x32xbf16>, vector<128x8xf32> -> vector<128x8xf32>
    %cst_8 = arith.constant dense<0.000000e+00> : vector<128x8xf32>
    %7 = tpu.matmul %1, %5, %cst_8 {dimension_numbers = #tpu.dot_dimension_numbers<[1], [1], [0], [0], [0, 0, 1, 0], [], []>} : vector<128x32xbf16>, vector<8x32xbf16>, vector<128x8xf32> -> vector<128x8xf32>
    %8 = arith.truncf %6 : vector<128x8xf32> to vector<128x8xbf16>
    %9 = arith.truncf %7 : vector<128x8xf32> to vector<128x8xbf16>
    %10 = vector.extract_strided_slice %8 {offsets = [0, 0], sizes = [32, 8], strides = [1, 1]} : vector<128x8xbf16> to vector<32x8xbf16>
    %cst_9 = arith.constant dense<0.000000e+00> : vector<8x8xf32>
    %11 = tpu.matmul %5, %10, %cst_9 {dimension_numbers = #tpu.dot_dimension_numbers<[1], [0], [0], [1], [0, 0, 1, 1], [], []>} : vector<8x32xbf16>, vector<32x8xbf16>, vector<8x8xf32> -> vector<8x8xf32>
    %cst_10 = arith.constant dense<0xFF800000> : vector<8xf32>
    %12 = vector.multi_reduction <maximumf>, %11, %cst_10 [1] : vector<8x8xf32> to vector<8xf32>
    %13 = vector.shape_cast %12 : vector<8xf32> to vector<8x1xf32>
    %14 = vector.broadcast %13 : vector<8x1xf32> to vector<8x8xf32>
    %15 = arith.subf %11, %14 : vector<8x8xf32>
    %16 = math.exp %15 : vector<8x8xf32>
    %cst_11 = arith.constant dense<0.000000e+00> : vector<8xf32>
    %17 = vector.multi_reduction <add>, %16, %cst_11 [1] : vector<8x8xf32> to vector<8xf32>
    %18 = vector.shape_cast %17 : vector<8xf32> to vector<8x1xf32>
    %19 = tpu.reciprocal %18 {approx = true} : vector<8x1xf32> -> vector<8x1xf32>
    %20 = arith.mulf %18, %19 : vector<8x1xf32>
    %cst_12 = arith.constant 2.000000e+00 : f32
    %21 = vector.broadcast %cst_12 : f32 to vector<8x1xf32>
    %22 = arith.subf %21, %20 : vector<8x1xf32>
    %23 = arith.mulf %19, %22 : vector<8x1xf32>
    %24 = vector.broadcast %23 : vector<8x1xf32> to vector<8x8xf32>
    %25 = arith.mulf %16, %24 : vector<8x8xf32>
    %26 = arith.truncf %25 : vector<8x8xf32> to vector<8x8xbf16>
    %27 = vector.extract_strided_slice %9 {offsets = [0, 0], sizes = [32, 8], strides = [1, 1]} : vector<128x8xbf16> to vector<32x8xbf16>
    %cst_13 = arith.constant dense<0.000000e+00> : vector<8x32xf32>
    %28 = tpu.matmul %26, %27, %cst_13 {dimension_numbers = #tpu.dot_dimension_numbers<[1], [1], [0], [0], [0, 0, 1, 0], [], []>} : vector<8x8xbf16>, vector<32x8xbf16>, vector<8x32xf32> -> vector<8x32xf32>
    %29 = vector.extract_strided_slice %8 {offsets = [32, 0], sizes = [32, 8], strides = [1, 1]} : vector<128x8xbf16> to vector<32x8xbf16>
    %cst_14 = arith.constant dense<0.000000e+00> : vector<8x8xf32>
    %30 = tpu.matmul %5, %29, %cst_14 {dimension_numbers = #tpu.dot_dimension_numbers<[1], [0], [0], [1], [0, 0, 1, 1], [], []>} : vector<8x32xbf16>, vector<32x8xbf16>, vector<8x8xf32> -> vector<8x8xf32>
    %cst_15 = arith.constant dense<0xFF800000> : vector<8xf32>
    %31 = vector.multi_reduction <maximumf>, %30, %cst_15 [1] : vector<8x8xf32> to vector<8xf32>
    %32 = vector.shape_cast %31 : vector<8xf32> to vector<8x1xf32>
    %33 = vector.broadcast %32 : vector<8x1xf32> to vector<8x8xf32>
    %34 = arith.subf %30, %33 : vector<8x8xf32>
    %35 = math.exp %34 : vector<8x8xf32>
    %cst_16 = arith.constant dense<0.000000e+00> : vector<8xf32>
    %36 = vector.multi_reduction <add>, %35, %cst_16 [1] : vector<8x8xf32> to vector<8xf32>
    %37 = vector.shape_cast %36 : vector<8xf32> to vector<8x1xf32>
    %38 = tpu.reciprocal %37 {approx = true} : vector<8x1xf32> -> vector<8x1xf32>
    %39 = arith.mulf %37, %38 : vector<8x1xf32>
    %cst_17 = arith.constant 2.000000e+00 : f32
    %40 = vector.broadcast %cst_17 : f32 to vector<8x1xf32>
    %41 = arith.subf %40, %39 : vector<8x1xf32>
    %42 = arith.mulf %38, %41 : vector<8x1xf32>
    %43 = vector.broadcast %42 : vector<8x1xf32> to vector<8x8xf32>
    %44 = arith.mulf %35, %43 : vector<8x8xf32>
    %45 = arith.truncf %44 : vector<8x8xf32> to vector<8x8xbf16>
    %46 = vector.extract_strided_slice %9 {offsets = [32, 0], sizes = [32, 8], strides = [1, 1]} : vector<128x8xbf16> to vector<32x8xbf16>
    %cst_18 = arith.constant dense<0.000000e+00> : vector<8x32xf32>
    %47 = tpu.matmul %45, %46, %cst_18 {dimension_numbers = #tpu.dot_dimension_numbers<[1], [1], [0], [0], [0, 0, 1, 0], [], []>} : vector<8x8xbf16>, vector<32x8xbf16>, vector<8x32xf32> -> vector<8x32xf32>
    %48 = arith.addf %28, %47 : vector<8x32xf32>
    %49 = vector.extract_strided_slice %8 {offsets = [64, 0], sizes = [32, 8], strides = [1, 1]} : vector<128x8xbf16> to vector<32x8xbf16>
    %cst_19 = arith.constant dense<0.000000e+00> : vector<8x8xf32>
    %50 = tpu.matmul %5, %49, %cst_19 {dimension_numbers = #tpu.dot_dimension_numbers<[1], [0], [0], [1], [0, 0, 1, 1], [], []>} : vector<8x32xbf16>, vector<32x8xbf16>, vector<8x8xf32> -> vector<8x8xf32>
    %cst_20 = arith.constant dense<0xFF800000> : vector<8xf32>
    %51 = vector.multi_reduction <maximumf>, %50, %cst_20 [1] : vector<8x8xf32> to vector<8xf32>
    %52 = vector.shape_cast %51 : vector<8xf32> to vector<8x1xf32>
    %53 = vector.broadcast %52 : vector<8x1xf32> to vector<8x8xf32>
    %54 = arith.subf %50, %53 : vector<8x8xf32>
    %55 = math.exp %54 : vector<8x8xf32>
    %cst_21 = arith.constant dense<0.000000e+00> : vector<8xf32>
    %56 = vector.multi_reduction <add>, %55, %cst_21 [1] : vector<8x8xf32> to vector<8xf32>
    %57 = vector.shape_cast %56 : vector<8xf32> to vector<8x1xf32>
    %58 = tpu.reciprocal %57 {approx = true} : vector<8x1xf32> -> vector<8x1xf32>
    %59 = arith.mulf %57, %58 : vector<8x1xf32>
    %cst_22 = arith.constant 2.000000e+00 : f32
    %60 = vector.broadcast %cst_22 : f32 to vector<8x1xf32>
    %61 = arith.subf %60, %59 : vector<8x1xf32>
    %62 = arith.mulf %58, %61 : vector<8x1xf32>
    %63 = vector.broadcast %62 : vector<8x1xf32> to vector<8x8xf32>
    %64 = arith.mulf %55, %63 : vector<8x8xf32>
    %65 = arith.truncf %64 : vector<8x8xf32> to vector<8x8xbf16>
    %66 = vector.extract_strided_slice %9 {offsets = [64, 0], sizes = [32, 8], strides = [1, 1]} : vector<128x8xbf16> to vector<32x8xbf16>
    %cst_23 = arith.constant dense<0.000000e+00> : vector<8x32xf32>
    %67 = tpu.matmul %65, %66, %cst_23 {dimension_numbers = #tpu.dot_dimension_numbers<[1], [1], [0], [0], [0, 0, 1, 0], [], []>} : vector<8x8xbf16>, vector<32x8xbf16>, vector<8x32xf32> -> vector<8x32xf32>
    %68 = arith.addf %48, %67 : vector<8x32xf32>
    %69 = vector.extract_strided_slice %8 {offsets = [96, 0], sizes = [32, 8], strides = [1, 1]} : vector<128x8xbf16> to vector<32x8xbf16>
    %cst_24 = arith.constant dense<0.000000e+00> : vector<8x8xf32>
    %70 = tpu.matmul %5, %69, %cst_24 {dimension_numbers = #tpu.dot_dimension_numbers<[1], [0], [0], [1], [0, 0, 1, 1], [], []>} : vector<8x32xbf16>, vector<32x8xbf16>, vector<8x8xf32> -> vector<8x8xf32>
    %cst_25 = arith.constant dense<0xFF800000> : vector<8xf32>
    %71 = vector.multi_reduction <maximumf>, %70, %cst_25 [1] : vector<8x8xf32> to vector<8xf32>
    %72 = vector.shape_cast %71 : vector<8xf32> to vector<8x1xf32>
    %73 = vector.broadcast %72 : vector<8x1xf32> to vector<8x8xf32>
    %74 = arith.subf %70, %73 : vector<8x8xf32>
    %75 = math.exp %74 : vector<8x8xf32>
    %cst_26 = arith.constant dense<0.000000e+00> : vector<8xf32>
    %76 = vector.multi_reduction <add>, %75, %cst_26 [1] : vector<8x8xf32> to vector<8xf32>
    %77 = vector.shape_cast %76 : vector<8xf32> to vector<8x1xf32>
    %78 = tpu.reciprocal %77 {approx = true} : vector<8x1xf32> -> vector<8x1xf32>
    %79 = arith.mulf %77, %78 : vector<8x1xf32>
    %cst_27 = arith.constant 2.000000e+00 : f32
    %80 = vector.broadcast %cst_27 : f32 to vector<8x1xf32>
    %81 = arith.subf %80, %79 : vector<8x1xf32>
    %82 = arith.mulf %78, %81 : vector<8x1xf32>
    %83 = vector.broadcast %82 : vector<8x1xf32> to vector<8x8xf32>
    %84 = arith.mulf %75, %83 : vector<8x8xf32>
    %85 = arith.truncf %84 : vector<8x8xf32> to vector<8x8xbf16>
    %86 = vector.extract_strided_slice %9 {offsets = [96, 0], sizes = [32, 8], strides = [1, 1]} : vector<128x8xbf16> to vector<32x8xbf16>
    %cst_28 = arith.constant dense<0.000000e+00> : vector<8x32xf32>
    %87 = tpu.matmul %85, %86, %cst_28 {dimension_numbers = #tpu.dot_dimension_numbers<[1], [1], [0], [0], [0, 0, 1, 0], [], []>} : vector<8x8xbf16>, vector<32x8xbf16>, vector<8x32xf32> -> vector<8x32xf32>
    %88 = arith.addf %68, %87 : vector<8x32xf32>
    %89 = vector.broadcast %2 : vector<1x32xf32> to vector<8x32xf32>
    %90 = arith.addf %88, %89 : vector<8x32xf32>
    %c0_29 = arith.constant 0 : index
    %c0_30 = arith.constant 0 : index
    %c0_31 = arith.constant 0 : index
    %91 = vector.load %arg5[%c0_29, %c0_30, %c0_31] : memref<2x8x32xf32, #tpu.memory_space<vmem>>, vector<1x8x32xf32>
    %92 = vector.shape_cast %91 : vector<1x8x32xf32> to vector<8x32xf32>
    %93 = vector.shape_cast %90 : vector<8x32xf32> to vector<1x8x32xf32>
    tpu.vector_store %arg5[%c0_29, %c0_30, %c0_31], %93 {strides = array<i32>} : memref<2x8x32xf32, #tpu.memory_space<vmem>>, vector<1x8x32xf32>,
    %c1 = arith.constant 1 : index
    %c0_32 = arith.constant 0 : index
    %c0_33 = arith.constant 0 : index
    %94 = vector.load %arg1[%c1, %c0_32, %c0_33] : memref<2x8x32xf32, #tpu.memory_space<vmem>>, vector<1x8x32xf32>
    %95 = vector.shape_cast %94 : vector<1x8x32xf32> to vector<8x32xf32>
    %96 = arith.truncf %95 : vector<8x32xf32> to vector<8x32xbf16>
    %cst_34 = arith.constant dense<0.000000e+00> : vector<128x8xf32>
    %97 = tpu.matmul %0, %96, %cst_34 {dimension_numbers = #tpu.dot_dimension_numbers<[1], [1], [0], [0], [0, 0, 1, 0], [], []>} : vector<128x32xbf16>, vector<8x32xbf16>, vector<128x8xf32> -> vector<128x8xf32>
    %cst_35 = arith.constant dense<0.000000e+00> : vector<128x8xf32>
    %98 = tpu.matmul %1, %96, %cst_35 {dimension_numbers = #tpu.dot_dimension_numbers<[1], [1], [0], [0], [0, 0, 1, 0], [], []>} : vector<128x32xbf16>, vector<8x32xbf16>, vector<128x8xf32> -> vector<128x8xf32>
    %99 = arith.truncf %97 : vector<128x8xf32> to vector<128x8xbf16>
    %100 = arith.truncf %98 : vector<128x8xf32> to vector<128x8xbf16>
    %101 = vector.extract_strided_slice %99 {offsets = [0, 0], sizes = [32, 8], strides = [1, 1]} : vector<128x8xbf16> to vector<32x8xbf16>
    %cst_36 = arith.constant dense<0.000000e+00> : vector<8x8xf32>
    %102 = tpu.matmul %96, %101, %cst_36 {dimension_numbers = #tpu.dot_dimension_numbers<[1], [0], [0], [1], [0, 0, 1, 1], [], []>} : vector<8x32xbf16>, vector<32x8xbf16>, vector<8x8xf32> -> vector<8x8xf32>
    %cst_37 = arith.constant dense<0xFF800000> : vector<8xf32>
    %103 = vector.multi_reduction <maximumf>, %102, %cst_37 [1] : vector<8x8xf32> to vector<8xf32>
    %104 = vector.shape_cast %103 : vector<8xf32> to vector<8x1xf32>
    %105 = vector.broadcast %104 : vector<8x1xf32> to vector<8x8xf32>
    %106 = arith.subf %102, %105 : vector<8x8xf32>
    %107 = math.exp %106 : vector<8x8xf32>
    %cst_38 = arith.constant dense<0.000000e+00> : vector<8xf32>
    %108 = vector.multi_reduction <add>, %107, %cst_38 [1] : vector<8x8xf32> to vector<8xf32>
    %109 = vector.shape_cast %108 : vector<8xf32> to vector<8x1xf32>
    %110 = tpu.reciprocal %109 {approx = true} : vector<8x1xf32> -> vector<8x1xf32>
    %111 = arith.mulf %109, %110 : vector<8x1xf32>
    %cst_39 = arith.constant 2.000000e+00 : f32
    %112 = vector.broadcast %cst_39 : f32 to vector<8x1xf32>
    %113 = arith.subf %112, %111 : vector<8x1xf32>
    %114 = arith.mulf %110, %113 : vector<8x1xf32>
    %115 = vector.broadcast %114 : vector<8x1xf32> to vector<8x8xf32>
    %116 = arith.mulf %107, %115 : vector<8x8xf32>
    %117 = arith.truncf %116 : vector<8x8xf32> to vector<8x8xbf16>
    %118 = vector.extract_strided_slice %100 {offsets = [0, 0], sizes = [32, 8], strides = [1, 1]} : vector<128x8xbf16> to vector<32x8xbf16>
    %cst_40 = arith.constant dense<0.000000e+00> : vector<8x32xf32>
    %119 = tpu.matmul %117, %118, %cst_40 {dimension_numbers = #tpu.dot_dimension_numbers<[1], [1], [0], [0], [0, 0, 1, 0], [], []>} : vector<8x8xbf16>, vector<32x8xbf16>, vector<8x32xf32> -> vector<8x32xf32>
    %120 = vector.extract_strided_slice %99 {offsets = [32, 0], sizes = [32, 8], strides = [1, 1]} : vector<128x8xbf16> to vector<32x8xbf16>
    %cst_41 = arith.constant dense<0.000000e+00> : vector<8x8xf32>
    %121 = tpu.matmul %96, %120, %cst_41 {dimension_numbers = #tpu.dot_dimension_numbers<[1], [0], [0], [1], [0, 0, 1, 1], [], []>} : vector<8x32xbf16>, vector<32x8xbf16>, vector<8x8xf32> -> vector<8x8xf32>
    %cst_42 = arith.constant dense<0xFF800000> : vector<8xf32>
    %122 = vector.multi_reduction <maximumf>, %121, %cst_42 [1] : vector<8x8xf32> to vector<8xf32>
    %123 = vector.shape_cast %122 : vector<8xf32> to vector<8x1xf32>
    %124 = vector.broadcast %123 : vector<8x1xf32> to vector<8x8xf32>
    %125 = arith.subf %121, %124 : vector<8x8xf32>
    %126 = math.exp %125 : vector<8x8xf32>
    %cst_43 = arith.constant dense<0.000000e+00> : vector<8xf32>
    %127 = vector.multi_reduction <add>, %126, %cst_43 [1] : vector<8x8xf32> to vector<8xf32>
    %128 = vector.shape_cast %127 : vector<8xf32> to vector<8x1xf32>
    %129 = tpu.reciprocal %128 {approx = true} : vector<8x1xf32> -> vector<8x1xf32>
    %130 = arith.mulf %128, %129 : vector<8x1xf32>
    %cst_44 = arith.constant 2.000000e+00 : f32
    %131 = vector.broadcast %cst_44 : f32 to vector<8x1xf32>
    %132 = arith.subf %131, %130 : vector<8x1xf32>
    %133 = arith.mulf %129, %132 : vector<8x1xf32>
    %134 = vector.broadcast %133 : vector<8x1xf32> to vector<8x8xf32>
    %135 = arith.mulf %126, %134 : vector<8x8xf32>
    %136 = arith.truncf %135 : vector<8x8xf32> to vector<8x8xbf16>
    %137 = vector.extract_strided_slice %100 {offsets = [32, 0], sizes = [32, 8], strides = [1, 1]} : vector<128x8xbf16> to vector<32x8xbf16>
    %cst_45 = arith.constant dense<0.000000e+00> : vector<8x32xf32>
    %138 = tpu.matmul %136, %137, %cst_45 {dimension_numbers = #tpu.dot_dimension_numbers<[1], [1], [0], [0], [0, 0, 1, 0], [], []>} : vector<8x8xbf16>, vector<32x8xbf16>, vector<8x32xf32> -> vector<8x32xf32>
    %139 = arith.addf %119, %138 : vector<8x32xf32>
    %140 = vector.extract_strided_slice %99 {offsets = [64, 0], sizes = [32, 8], strides = [1, 1]} : vector<128x8xbf16> to vector<32x8xbf16>
    %cst_46 = arith.constant dense<0.000000e+00> : vector<8x8xf32>
    %141 = tpu.matmul %96, %140, %cst_46 {dimension_numbers = #tpu.dot_dimension_numbers<[1], [0], [0], [1], [0, 0, 1, 1], [], []>} : vector<8x32xbf16>, vector<32x8xbf16>, vector<8x8xf32> -> vector<8x8xf32>
    %cst_47 = arith.constant dense<0xFF800000> : vector<8xf32>
    %142 = vector.multi_reduction <maximumf>, %141, %cst_47 [1] : vector<8x8xf32> to vector<8xf32>
    %143 = vector.shape_cast %142 : vector<8xf32> to vector<8x1xf32>
    %144 = vector.broadcast %143 : vector<8x1xf32> to vector<8x8xf32>
    %145 = arith.subf %141, %144 : vector<8x8xf32>
    %146 = math.exp %145 : vector<8x8xf32>
    %cst_48 = arith.constant dense<0.000000e+00> : vector<8xf32>
    %147 = vector.multi_reduction <add>, %146, %cst_48 [1] : vector<8x8xf32> to vector<8xf32>
    %148 = vector.shape_cast %147 : vector<8xf32> to vector<8x1xf32>
    %149 = tpu.reciprocal %148 {approx = true} : vector<8x1xf32> -> vector<8x1xf32>
    %150 = arith.mulf %148, %149 : vector<8x1xf32>
    %cst_49 = arith.constant 2.000000e+00 : f32
    %151 = vector.broadcast %cst_49 : f32 to vector<8x1xf32>
    %152 = arith.subf %151, %150 : vector<8x1xf32>
    %153 = arith.mulf %149, %152 : vector<8x1xf32>
    %154 = vector.broadcast %153 : vector<8x1xf32> to vector<8x8xf32>
    %155 = arith.mulf %146, %154 : vector<8x8xf32>
    %156 = arith.truncf %155 : vector<8x8xf32> to vector<8x8xbf16>
    %157 = vector.extract_strided_slice %100 {offsets = [64, 0], sizes = [32, 8], strides = [1, 1]} : vector<128x8xbf16> to vector<32x8xbf16>
    %cst_50 = arith.constant dense<0.000000e+00> : vector<8x32xf32>
    %158 = tpu.matmul %156, %157, %cst_50 {dimension_numbers = #tpu.dot_dimension_numbers<[1], [1], [0], [0], [0, 0, 1, 0], [], []>} : vector<8x8xbf16>, vector<32x8xbf16>, vector<8x32xf32> -> vector<8x32xf32>
    %159 = arith.addf %139, %158 : vector<8x32xf32>
    %160 = vector.extract_strided_slice %99 {offsets = [96, 0], sizes = [32, 8], strides = [1, 1]} : vector<128x8xbf16> to vector<32x8xbf16>
    %cst_51 = arith.constant dense<0.000000e+00> : vector<8x8xf32>
    %161 = tpu.matmul %96, %160, %cst_51 {dimension_numbers = #tpu.dot_dimension_numbers<[1], [0], [0], [1], [0, 0, 1, 1], [], []>} : vector<8x32xbf16>, vector<32x8xbf16>, vector<8x8xf32> -> vector<8x8xf32>
    %cst_52 = arith.constant dense<0xFF800000> : vector<8xf32>
    %162 = vector.multi_reduction <maximumf>, %161, %cst_52 [1] : vector<8x8xf32> to vector<8xf32>
    %163 = vector.shape_cast %162 : vector<8xf32> to vector<8x1xf32>
    %164 = vector.broadcast %163 : vector<8x1xf32> to vector<8x8xf32>
    %165 = arith.subf %161, %164 : vector<8x8xf32>
    %166 = math.exp %165 : vector<8x8xf32>
    %cst_53 = arith.constant dense<0.000000e+00> : vector<8xf32>
    %167 = vector.multi_reduction <add>, %166, %cst_53 [1] : vector<8x8xf32> to vector<8xf32>
    %168 = vector.shape_cast %167 : vector<8xf32> to vector<8x1xf32>
    %169 = tpu.reciprocal %168 {approx = true} : vector<8x1xf32> -> vector<8x1xf32>
    %170 = arith.mulf %168, %169 : vector<8x1xf32>
    %cst_54 = arith.constant 2.000000e+00 : f32
    %171 = vector.broadcast %cst_54 : f32 to vector<8x1xf32>
    %172 = arith.subf %171, %170 : vector<8x1xf32>
    %173 = arith.mulf %169, %172 : vector<8x1xf32>
    %174 = vector.broadcast %173 : vector<8x1xf32> to vector<8x8xf32>
    %175 = arith.mulf %166, %174 : vector<8x8xf32>
    %176 = arith.truncf %175 : vector<8x8xf32> to vector<8x8xbf16>
    %177 = vector.extract_strided_slice %100 {offsets = [96, 0], sizes = [32, 8], strides = [1, 1]} : vector<128x8xbf16> to vector<32x8xbf16>
    %cst_55 = arith.constant dense<0.000000e+00> : vector<8x32xf32>
    %178 = tpu.matmul %176, %177, %cst_55 {dimension_numbers = #tpu.dot_dimension_numbers<[1], [1], [0], [0], [0, 0, 1, 0], [], []>} : vector<8x8xbf16>, vector<32x8xbf16>, vector<8x32xf32> -> vector<8x32xf32>
    %179 = arith.addf %159, %178 : vector<8x32xf32>
    %180 = vector.broadcast %2 : vector<1x32xf32> to vector<8x32xf32>
    %181 = arith.addf %179, %180 : vector<8x32xf32>
    %c1_56 = arith.constant 1 : index
    %c0_57 = arith.constant 0 : index
    %c0_58 = arith.constant 0 : index
    %182 = vector.load %arg5[%c1_56, %c0_57, %c0_58] : memref<2x8x32xf32, #tpu.memory_space<vmem>>, vector<1x8x32xf32>
    %183 = vector.shape_cast %182 : vector<1x8x32xf32> to vector<8x32xf32>
    %184 = vector.shape_cast %181 : vector<8x32xf32> to vector<1x8x32xf32>
    tpu.vector_store %arg5[%c1_56, %c0_57, %c0_58], %184 {strides = array<i32>} : memref<2x8x32xf32, #tpu.memory_space<vmem>>, vector<1x8x32xf32>,
    return
  }
  func.func @transform_0(%arg0: i32) -> (i32, i32, i32) {
    %c0_i32 = arith.constant 0 : i32
    %c0_i32_0 = arith.constant 0 : i32
    %c0_i32_1 = arith.constant 0 : i32
    %c0_i32_2 = arith.constant 0 : i32
    return %c0_i32, %c0_i32_0, %c0_i32_1 : i32, i32, i32
  }
  func.func @transform_1(%arg0: i32) -> (i32, i32) {
    %c0_i32 = arith.constant 0 : i32
    %c0_i32_0 = arith.constant 0 : i32
    %c0_i32_1 = arith.constant 0 : i32
    return %c0_i32, %c0_i32_0 : i32, i32
  }
  func.func @transform_2(%arg0: i32) -> (i32, i32) {
    %c0_i32 = arith.constant 0 : i32
    %c0_i32_0 = arith.constant 0 : i32
    %c0_i32_1 = arith.constant 0 : i32
    return %c0_i32, %c0_i32_0 : i32, i32
  }
  func.func @transform_3(%arg0: i32) -> (i32, i32) {
    %c0_i32 = arith.constant 0 : i32
    %c0_i32_0 = arith.constant 0 : i32
    %c0_i32_1 = arith.constant 0 : i32
    return %c0_i32, %c0_i32_0 : i32, i32
  }
  func.func @transform_4(%arg0: i32) -> (i32, i32, i32) {
    %c0_i32 = arith.constant 0 : i32
    %c0_i32_0 = arith.constant 0 : i32
    %c0_i32_1 = arith.constant 0 : i32
    %c0_i32_2 = arith.constant 0 : i32
    return %c0_i32, %c0_i32_0, %c0_i32_1 : i32, i32, i32
  }
}

</mosaic_0001>

<bundles_post_ra>
// kernel: tpu_custom_call.1
= control target key start
LH: loop header
LB: loop body
LE: loop exit
PB: predicated region body
PF: predicated region fallthrough
CT: control target
= control target key end

     0   :  { %vm94_vm0 = vcmask 261120   ;;  %s1538_s0 = inlined_call_operand.vmem [shape: f32[2,8,32], index: 0, kind: input, shape index: {}]   ;;  %s1539_s1 = inlined_call_operand.vmem [shape: bf16[128,32], index: 1, kind: input, shape index: {}]   ;;  %s1540_s2 = inlined_call_operand.vmem [shape: bf16[128,32], index: 2, kind: input, shape index: {}]   ;;  %s1541_s3 = inlined_call_operand.vmem [shape: f32[1,32], index: 3, kind: input, shape index: {}]   ;;  %s1542_s4 = inlined_call_operand.hbm [shape: f32[2,8,32], index: 4, kind: output, shape index: {}]  }
   0x1   :  { %v52_v0 = vld [vmem:[%s1538_s0] sm:$0xff] }
   0x2   :  { %v1281_v1 = vpack.c.bf16 %v52_v0, %v52_v0 }
   0x3   :  { %9 = vsyncpa [#allocation3], 0  ;;  %v1288_v3 = vld [vmem:[%s1539_s1] sm:$0xff]  ;;  %v1295_v4 = vld [vmem:[%s1539_s1 + $0x8] sm:$0xff]  ;;  %vm341_vm1 = vcmask 64512   ;;  %s1047_s27 = sshll.u32 %s1542_s4, 4  ;;  %s1048_s27 = int_to_ptr.hbm [resolvable:$true] %s1047_s27 }
   0x4   :  { %v120_v2 = vsel %vm94_vm0, %v1281_v1, 0  ;;  %v1302_v5 = vld [vmem:[%s1539_s1 + $0x10] sm:$0xff]  ;;  %v1309_v6 = vld [vmem:[%s1539_s1 + $0x18] sm:$0xff]  ;;  %v1320_v35 = vld [vmem:[%s1540_s2] sm:$0xff]  ;;  %s1251_s28 = smov 128   ;;  %s1252_s29 = smov 8  }
   0x5   :  { %129 = vmatpush.bf16.xpose.msra.mxu0 %v120_v2  ;;  %242 = vmatpush.bf16.xpose.msra.mxu1 %v120_v2  ;;  %v1327_v36 = vld [vmem:[%s1539_s1 + $0x20] sm:$0xff]  ;;  %v1334_v37 = vld [vmem:[%s1540_s2 + $0x8] sm:$0xff]  ;;  %v1349_v41 = vld [vmem:[%s1540_s2 + $0x10] sm:$0xff] }
   0x6   :  { %v1341_v38 = vld [vmem:[%s1539_s1 + $0x28] sm:$0xff]  ;;  %v1354_v43 = vld [vmem:[%s1539_s1 + $0x30] sm:$0xff]  ;;  %v1363_v44 = vld [vmem:[%s1540_s2 + $0x18] sm:$0xff] }
   0x7   :  { %v1370_v45 = vld [vmem:[%s1539_s1 + $0x38] sm:$0xff] }
   0xc   :  { %1091 = vmatmul.msk.bf16.vlgmr.msra.gmra.mxu0 %vm94_vm0, %v1288_v3  ;;  %1131 = vmatmul.msk.bf16.vlgmr.msra.gmra.mxu1 %vm94_vm0, %v1320_v35 }
  0x1c   :  { %1092 = vmatmul.msk.bf16.gmra.mxu0 %vm94_vm0, %v1295_v4  ;;  %1132 = vmatmul.msk.bf16.gmra.mxu1 %vm94_vm0, %v1334_v37 }
  0x2c   :  { %1093 = vmatmul.msk.bf16.gmra.mxu0 %vm94_vm0, %v1302_v5  ;;  %1133 = vmatmul.msk.bf16.gmra.mxu1 %vm94_vm0, %v1349_v41 }
  0x3c   :  { %1094 = vmatmul.msk.bf16.gmra.mxu0 %vm94_vm0, %v1309_v6  ;;  %1134 = vmatmul.msk.bf16.gmra.mxu1 %vm94_vm0, %v1363_v44 }
  0x4c   :  { %1095 = vmatmul.msk.bf16.gmra.mxu0 %vm94_vm0, %v1327_v36 }
  0x5c   :  { %1096 = vmatmul.msk.bf16.gmra.mxu0 %vm94_vm0, %v1341_v38 }
  0x6c   :  { %1097 = vmatmul.msk.bf16.gmra.mxu0 %vm94_vm0, %v1354_v43 }
  0x7c   :  { %1098 = vmatmul.msk.bf16.gmra.mxu0 %vm94_vm0, %v1370_v45 }
  0x89   :  { %v131_v7 = vpop.f32.mrf.mxu0  ;;  %v244_v46 = vpop.f32.mrf.mxu1 }
  0x8a   :  { %v284_v14 = vpack.c.bf16 %v131_v7, %v131_v7  ;;  %v300_v55 = vpack.c.bf16 %v244_v46, %v244_v46 }
  0x8c   :  { %v320_v19 = vunpack.c.l.b16 %v284_v14  ;;  %v433_v62 = vunpack.c.l.b16 %v300_v55 }
  0x91   :  { %v133_v8 = vpop.f32.mrf.mxu0  ;;  %v246_v47 = vpop.f32.mrf.mxu1 }
  0x92   :  { %v285_v12 = vpack.c.bf16 %v133_v8, %v133_v8  ;;  %v301_v56 = vpack.c.bf16 %v246_v47, %v246_v47 }
  0x94   :  { %v321_v17 = vunpack.c.l.b16 %v285_v12  ;;  %v434_v63 = vunpack.c.l.b16 %v301_v56 }
  0x96   :  { %v324_v21 = vpack.c.b16 %v321_v17, %v320_v19  ;;  %v437_v8 = vpack.c.b16 %v434_v63, %v433_v62 }
  0x99   :  { %v136_v9 = vpop.f32.mrf.mxu0  ;;  %v249_v50 = vpop.f32.mrf.mxu1 }
  0x9a   :  { %v286_v10 = vpack.c.bf16 %v136_v9, %v136_v9  ;;  %v302_v52 = vpack.c.bf16 %v249_v50, %v249_v50  ;;  %v443_v9 = vsel %vm341_vm1, %v437_v8, 0 }
  0x9c   :  { %v322_v15 = vunpack.c.l.b16 %v286_v10  ;;  %v435_v57 = vunpack.c.l.b16 %v302_v52 }
  0xa1   :  { %v138_v11 = vpop.f32.mrf.mxu0  ;;  %v251_v53 = vpop.f32.mrf.mxu1 }
  0xa2   :  { %v287_v13 = vpack.c.bf16 %v138_v11, %v138_v11  ;;  %v303_v58 = vpack.c.bf16 %v251_v53, %v251_v53 }
  0xa4   :  { %v323_v16 = vunpack.c.l.b16 %v287_v13  ;;  %v436_v60 = vunpack.c.l.b16 %v303_v58 }
  0xa6   :  { %v325_v18 = vpack.c.b16 %v323_v16, %v322_v15  ;;  %v438_v0 = vpack.c.b16 %v436_v60, %v435_v57 }
  0xa8   :  { %334 = vmatpush.bf16.msra.mxu2 %v325_v18  ;;  %v446_v2 = vsel %vm341_vm1, %v438_v0, 0 }
  0xa9   :  { %v141_v20 = vpop.f32.mrf.mxu0  ;;  %v254_v7 = vpop.f32.mrf.mxu1 }
  0xaa   :  { %v288_v28 = vpack.c.bf16 %v141_v20, %v141_v20  ;;  %v304_v16 = vpack.c.bf16 %v254_v7, %v254_v7 }
  0xac   :  { %335 = vmatpush.bf16.msra.mxu2 %v324_v21  ;;  %v361_v33 = vunpack.c.l.b16 %v288_v28 }
  0xaf   :  { %1139 = vmatmul.msk.bf16.vlgmr.msra.gmra.mxu2 %vm94_vm0, %v1281_v1 }
  0xb1   :  { %v143_v22 = vpop.f32.mrf.mxu0  ;;  %v256_v11 = vpop.f32.mrf.mxu1 }
  0xb2   :  { %v289_v26 = vpack.c.bf16 %v143_v22, %v143_v22  ;;  %v305_v17 = vpack.c.bf16 %v256_v11, %v256_v11 }
  0xb4   :  { %v362_v31 = vunpack.c.l.b16 %v289_v26 }
  0xb6   :  { %v365_v34 = vpack.c.b16 %v362_v31, %v361_v33 }
  0xb9   :  { %v146_v23 = vpop.f32.mrf.mxu0  ;;  %v259_v12 = vpop.f32.mrf.mxu1 }
  0xba   :  { %v290_v24 = vpack.c.bf16 %v146_v23, %v146_v23  ;;  %v306_v14 = vpack.c.bf16 %v259_v12, %v259_v12  ;;  %v401_v23 = vunpack.c.l.b16 %v304_v16  ;;  %v1147_v12 = vld [vmem:[%s1538_s0 + $0x8] sm:$0xff] }
  0xbc   :  { %v363_v29 = vunpack.c.l.b16 %v290_v24  ;;  %v403_v18 = vunpack.c.l.b16 %v306_v14  ;;  %v402_v24 = vunpack.c.l.b16 %v305_v17 }
  0xc1   :  { %v148_v25 = vpop.f32.mrf.mxu0  ;;  %v261_v15 = vpop.f32.mrf.mxu1 }
  0xc2   :  { %v291_v27 = vpack.c.bf16 %v148_v25, %v148_v25  ;;  %v307_v19 = vpack.c.bf16 %v261_v15, %v261_v15 }
  0xc4   :  { %v364_v30 = vunpack.c.l.b16 %v291_v27  ;;  %v404_v21 = vunpack.c.l.b16 %v307_v19 }
  0xc6   :  { %v366_v32 = vpack.c.b16 %v364_v30, %v363_v29  ;;  %v406_v25 = vpack.c.b16 %v404_v21, %v403_v18  ;;  %v1436_v18 = vld [vmem:[%s1540_s2 + $0x30] sm:$0xff] }
  0xc8   :  { %375 = vmatpush.bf16.msra.mxu3 %v366_v32  ;;  %v414_v27 = vsel %vm341_vm1, %v406_v25, 0  ;;  %v405_v32 = vpack.c.b16 %v402_v24, %v401_v23 }
  0xc9   :  { %v151_v61 = vpop.f32.mrf.mxu0  ;;  %422 = vmatpush.bf16.xpose.msrb.mxu2 %v414_v27 }
  0xca   :  { %v292_v28 = vpack.c.bf16 %v151_v61, %v151_v61 }
  0xcc   :  { %376 = vmatpush.bf16.msra.mxu3 %v365_v34  ;;  %v465_v33 = vunpack.c.l.b16 %v292_v28 }
  0xcf   :  { %1140 = vmatmul.msk.bf16.vlgmr.msra.gmra.mxu3 %vm94_vm0, %v1281_v1 }
  0xd0   :  { %454 = vmatpush.bf16.xpose.msrb.mxu3 %v446_v2 }
  0xd1   :  { %v153_v10 = vpop.f32.mrf.mxu0 }
  0xd2   :  { %v293_v29 = vpack.c.bf16 %v153_v10, %v153_v10 }
  0xd4   :  { %v466_v34 = vunpack.c.l.b16 %v293_v29 }
  0xd8   :  { %455 = vmatpush.bf16.xpose.msrb.mxu3 %v443_v9 }
  0xd9   :  { %v156_v13 = vpop.f32.mrf.mxu0 }
  0xda   :  { %v294_v22 = vpack.c.bf16 %v156_v13, %v156_v13  ;;  %v1388_v13 = vpack.c.bf16 %v1147_v12, %v1147_v12 }
  0xdc   :  { %v467_v30 = vunpack.c.l.b16 %v294_v22  ;;  %v1392_v14 = vsel %vm94_vm0, %v1388_v13, 0  ;;  %v1447_v22 = vld [vmem:[%s1540_s2 + $0x38] sm:$0xff] }
  0xe1   :  { %v158_v20 = vpop.f32.mrf.mxu0 }
  0xe2   :  { %v295_v26 = vpack.c.bf16 %v158_v20, %v158_v20 }
  0xe4   :  { %v468_v31 = vunpack.c.l.b16 %v295_v26 }
  0xe9   :  { %v161_v46 = vpop.f32.mrf.mxu0 }
  0xea   :  { %v296_v63 = vpack.c.bf16 %v161_v46, %v161_v46 }
  0xec   :  { %v538_v9 = vunpack.c.l.b16 %v296_v63 }
  0xf1   :  { %v163_v47 = vpop.f32.mrf.mxu0 }
  0xf2   :  { %v297_v0 = vpack.c.bf16 %v163_v47, %v163_v47 }
  0xf4   :  { %v539_v10 = vunpack.c.l.b16 %v297_v0 }
  0xf6   :  { %v542_v11 = vpack.c.b16 %v539_v10, %v538_v9 }
 0x152   :  { %v378_v39 = vpop.f32.mrf.mxu3 }
 0x153   :  { %v382_v40 = vsel %vm341_vm1, %v378_v39, -inf }
 0x154   :  { %383 = vmax.xlane.f32.xlu0 %v382_v40  ;;  %v411_v40 = vsel %vm341_vm1, %v405_v32, 0 }
 0x155   :  { %423 = vmatpush.bf16.xpose.msrb.mxu2 %v411_v40 }
 0x15a   :  { %v380_v42 = vpop.f32.mrf.mxu3 }
 0x15b   :  { %v469_v42 = vpack.c.b16 %v466_v34, %v465_v33 }
 0x1c7   :  { %v384_v48 = vpop.xlane.xlu0 %383 }
 0x1c8   :  { %v385_v49 = vsub.f32 %v378_v39, %v384_v48  ;;  %v470_v39 = vpack.c.b16 %v468_v31, %v467_v30  ;;  %v337_v48 = vpop.f32.mrf.mxu2 }
 0x1ca   :  { %v386_v51 = vmul.f32 1.442695, %v385_v49  ;;  %479 = vmatpush.bf16.msra.mxu2 %v470_v39  ;;  %v342_v49 = vsel %vm341_vm1, %v337_v48, -inf }
 0x1cb   :  { %343 = vmax.xlane.f32.xlu1 %v342_v49 }
 0x1cc   :  { %1192 = vpow2.f32 %v386_v51  ;;  %v166_v51 = vpop.f32.mrf.mxu0 }
 0x1cd   :  { %v298_v56 = vpack.c.bf16 %v166_v51, %v166_v51 }
 0x1ce   :  { %480 = vmatpush.bf16.msra.mxu2 %v469_v42 }
 0x1cf   :  { %v540_v60 = vunpack.c.l.b16 %v298_v56 }
 0x1d0   :  { %v339_v50 = vpop.f32.mrf.mxu2 }
 0x1d2   :  { %v1374_v54 = vpop.eup %1192 }
 0x1d3   :  { %v388_v59 = vsel %vm341_vm1, %v1374_v54, 0.0 }
 0x1d4   :  { %389 = vadd.xlane.f32.xlu0 %v388_v59  ;;  %v168_v53 = vpop.f32.mrf.mxu0 }
 0x1d5   :  { %v299_v57 = vpack.c.bf16 %v168_v53, %v168_v53 }
 0x1d7   :  { %v541_v61 = vunpack.c.l.b16 %v299_v57 }
 0x1d9   :  { %v543_v7 = vpack.c.b16 %v541_v61, %v540_v60 }
 0x247   :  { %v390_v52 = vpop.xlane.xlu0 %389 }
 0x248   :  { %1194 = vrcp.f32 %v390_v52 }
 0x24e   :  { %v1195_v55 = vpop.eup %1194 }
 0x24f   :  { %v392_v58 = vmul.f32 %v1195_v55, %v390_v52 }
 0x251   :  { %v393_v59 = vsub.f32 2.0, %v392_v58 }
 0x253   :  { %v394_v62 = vmul.f32 %v1195_v55, %v393_v59 }
 0x255   :  { %v395_v2 = vmul.f32 %v1374_v54, %v394_v62 }
 0x257   :  { %v396_v8 = vpack.c.bf16 %v395_v2, %v395_v2 }
 0x259   :  { %1141 = vmatmul.msk.bf16.vlgmr.msrb.gmra.mxu2 %vm341_vm1, %v396_v8 }
 0x25a   :  { %552 = vmatpush.bf16.msrb.mxu2 %v543_v7 }
 0x25e   :  { %553 = vmatpush.bf16.msrb.mxu2 %v542_v11 }
 0x269   :  { %1143 = vmatmul.msk.bf16.vlgmr.msra.gmra.mxu2 %vm94_vm0, %v1281_v1 }
 0x26a   :  { %625 = vmatpush.bf16.xpose.msra.mxu2 %v1392_v14 }
 0x279   :  { %1145 = vmatmul.msk.bf16.vlgmr.msrb.gmra.mxu2 %vm94_vm0, %v1281_v1  ;;  %v1416_v1 = vld [vmem:[%s1540_s2 + $0x20] sm:$0xff] }
 0x27a   :  { %1135 = vmatmul.msk.bf16.gmra.mxu1 %vm94_vm0, %v1416_v1 }
 0x289   :  { %1148 = vmatmul.msk.bf16.vlgmr.msra.gmra.mxu2 %vm94_vm0, %v1288_v3 }
 0x299   :  { %1149 = vmatmul.msk.bf16.gmra.mxu2 %vm94_vm0, %v1295_v4 }
 0x2a9   :  { %1150 = vmatmul.msk.bf16.gmra.mxu2 %vm94_vm0, %v1302_v5 }
 0x2b9   :  { %1151 = vmatmul.msk.bf16.gmra.mxu2 %vm94_vm0, %v1309_v6  ;;  %v1426_v6 = vld [vmem:[%s1540_s2 + $0x28] sm:$0xff] }
 0x2ba   :  { %1136 = vmatmul.msk.bf16.gmra.mxu1 %vm94_vm0, %v1426_v6 }
 0x2c9   :  { %1152 = vmatmul.msk.bf16.gmra.mxu2 %vm94_vm0, %v1327_v36  ;;  %v344_v36 = vpop.xlane.xlu1 %343 }
 0x2ca   :  { %1137 = vmatmul.msk.bf16.gmra.mxu1 %vm94_vm0, %v1436_v18 }
 0x2d9   :  { %1153 = vmatmul.msk.bf16.gmra.mxu2 %vm94_vm0, %v1341_v38  ;;  %v345_v38 = vsub.f32 %v337_v48, %v344_v36 }
 0x2da   :  { %1138 = vmatmul.msk.bf16.gmra.mxu1 %vm94_vm0, %v1447_v22 }
 0x2db   :  { %v346_v16 = vmul.f32 1.442695, %v345_v38 }
 0x2dc   :  { %v1411_v54 = vpop.f32.mrf.mxu2 }
 0x2dd   :  { %1196 = vpow2.f32 %v346_v16 }
 0x2e3   :  { %v1438_v19 = vpop.eup %1196 }
 0x2e4   :  { %v427_v3 = vpop.f32.mrf.mxu2  ;;  %v348_v21 = vsel %vm341_vm1, %v1438_v19, 0.0 }
 0x2e9   :  { %1154 = vmatmul.msk.bf16.gmra.mxu2 %vm94_vm0, %v1354_v43 }
 0x2ec   :  { %v482_v4 = vpop.f32.mrf.mxu2 }
 0x2ed   :  { %v486_v5 = vsel %vm341_vm1, %v482_v4, -inf }
 0x2ee   :  { %487 = vmax.xlane.f32.xlu1 %v486_v5 }
 0x2f4   :  { %v484_v15 = vpop.f32.mrf.mxu2 }
 0x2f7   :  { %v264_v59 = vpop.f32.mrf.mxu1 }
 0x2f9   :  { %1155 = vmatmul.msk.bf16.gmra.mxu2 %vm94_vm0, %v1370_v45 }
 0x2fc   :  { %v555_v43 = vpop.f32.mrf.mxu2 }
 0x2fd   :  { %v559_v17 = vsel %vm341_vm1, %v555_v43, -inf }
 0x2fe   :  { %560 = vmax.xlane.f32.xlu2 %v559_v17 }
 0x2ff   :  { %v266_v63 = vpop.f32.mrf.mxu1 }
 0x300   :  { %v309_v38 = vpack.c.bf16 %v266_v63, %v266_v63 }
 0x304   :  { %v557_v20 = vpop.f32.mrf.mxu2 }
 0x306   :  { %349 = vadd.xlane.f32.xlu2 %v348_v21 }
 0x30c   :  { %v627_v45 = vpop.f32.mrf.mxu2 }
 0x30d   :  { %v716_v27 = vpack.c.bf16 %v627_v45, %v627_v45  ;;  %v506_v45 = vunpack.c.l.b16 %v309_v38 }
 0x30f   :  { %v752_v32 = vunpack.c.l.b16 %v716_v27 }
 0x314   :  { %v629_v23 = vpop.f32.mrf.mxu2 }
 0x315   :  { %v717_v28 = vpack.c.bf16 %v629_v23, %v629_v23 }
 0x317   :  { %v753_v33 = vunpack.c.l.b16 %v717_v28 }
 0x319   :  { %v756_v40 = vpack.c.b16 %v753_v33, %v752_v32 }
 0x31c   :  { %v632_v24 = vpop.f32.mrf.mxu2 }
 0x31d   :  { %v718_v25 = vpack.c.bf16 %v632_v24, %v632_v24 }
 0x31f   :  { %v754_v29 = vunpack.c.l.b16 %v718_v25 }
 0x324   :  { %v634_v26 = vpop.f32.mrf.mxu2 }
 0x325   :  { %v719_v30 = vpack.c.bf16 %v634_v26, %v634_v26 }
 0x327   :  { %v755_v31 = vunpack.c.l.b16 %v719_v30 }
 0x329   :  { %v757_v34 = vpack.c.b16 %v755_v31, %v754_v29 }
 0x32b   :  { %766 = vmatpush.bf16.msrb.mxu0 %v757_v34 }
 0x32c   :  { %v637_v39 = vpop.f32.mrf.mxu2 }
 0x32d   :  { %v720_v49 = vpack.c.bf16 %v637_v39, %v637_v39 }
 0x32f   :  { %767 = vmatpush.bf16.msrb.mxu0 %v756_v40  ;;  %v792_v55 = vunpack.c.l.b16 %v720_v49 }
 0x332   :  { %1164 = vmatmul.msk.bf16.vlgmr.msrb.gmra.mxu0 %vm94_vm0, %v1388_v13 }
 0x334   :  { %v639_v42 = vpop.f32.mrf.mxu2 }
 0x335   :  { %v721_v50 = vpack.c.bf16 %v639_v42, %v639_v42 }
 0x337   :  { %v793_v56 = vunpack.c.l.b16 %v721_v50  ;;  %v269_v7 = vpop.f32.mrf.mxu1 }
 0x338   :  { %v310_v11 = vpack.c.bf16 %v269_v7, %v269_v7 }
 0x339   :  { %v796_v58 = vpack.c.b16 %v793_v56, %v792_v55 }
 0x33a   :  { %v507_v3 = vunpack.c.l.b16 %v310_v11 }
 0x33c   :  { %v642_v46 = vpop.f32.mrf.mxu2 }
 0x33d   :  { %v722_v47 = vpack.c.bf16 %v642_v46, %v642_v46 }
 0x33f   :  { %v794_v51 = vunpack.c.l.b16 %v722_v47  ;;  %v271_v12 = vpop.f32.mrf.mxu1 }
 0x340   :  { %v311_v5 = vpack.c.bf16 %v271_v12, %v271_v12 }
 0x342   :  { %v508_v15 = vunpack.c.l.b16 %v311_v5 }
 0x344   :  { %v644_v48 = vpop.f32.mrf.mxu2  ;;  %v510_v17 = vpack.c.b16 %v508_v15, %v507_v3 }
 0x345   :  { %v723_v52 = vpack.c.bf16 %v644_v48, %v644_v48 }
 0x347   :  { %v795_v53 = vunpack.c.l.b16 %v723_v52  ;;  %v274_v23 = vpop.f32.mrf.mxu1 }
 0x348   :  { %v312_v46 = vpack.c.bf16 %v274_v23, %v274_v23 }
 0x349   :  { %v797_v57 = vpack.c.b16 %v795_v53, %v794_v51 }
 0x34a   :  { %v578_v50 = vunpack.c.l.b16 %v312_v46 }
 0x34b   :  { %806 = vmatpush.bf16.msrb.mxu1 %v797_v57 }
 0x34f   :  { %807 = vmatpush.bf16.msrb.mxu1 %v796_v58  ;;  %v276_v31 = vpop.f32.mrf.mxu1 }
 0x350   :  { %v313_v47 = vpack.c.bf16 %v276_v31, %v276_v31 }
 0x352   :  { %1165 = vmatmul.msk.bf16.vlgmr.msrb.gmra.mxu1 %vm94_vm0, %v1388_v13  ;;  %v579_v51 = vunpack.c.l.b16 %v313_v47 }
 0x357   :  { %v279_v33 = vpop.f32.mrf.mxu1 }
 0x358   :  { %v314_v34 = vpack.c.bf16 %v279_v33, %v279_v33 }
 0x35a   :  { %v580_v40 = vunpack.c.l.b16 %v314_v34 }
 0x35f   :  { %v281_v39 = vpop.f32.mrf.mxu1 }
 0x360   :  { %v315_v42 = vpack.c.bf16 %v281_v39, %v281_v39 }
 0x361   :  { %v488_v60 = vpop.xlane.xlu1 %487 }
 0x362   :  { %v489_v61 = vsub.f32 %v482_v4, %v488_v60  ;;  %v308_v4 = vpack.c.bf16 %v264_v59, %v264_v59  ;;  %v581_v48 = vunpack.c.l.b16 %v315_v42 }
 0x364   :  { %v490_v62 = vmul.f32 1.442695, %v489_v61  ;;  %v505_v21 = vunpack.c.l.b16 %v308_v4  ;;  %v583_v49 = vpack.c.b16 %v581_v48, %v580_v40 }
 0x366   :  { %1198 = vpow2.f32 %v490_v62  ;;  %v509_v26 = vpack.c.b16 %v506_v45, %v505_v21  ;;  %v591_v52 = vsel %vm341_vm1, %v583_v49, 0 }
 0x368   :  { %v515_v29 = vsel %vm341_vm1, %v509_v26, 0 }
 0x36c   :  { %v1455_v0 = vpop.eup %1198 }
 0x36d   :  { %v492_v2 = vsel %vm341_vm1, %v1455_v0, 0.0 }
 0x36e   :  { %493 = vadd.xlane.f32.xlu0 %v492_v2 }
 0x371   :  { %v561_v8 = vpop.xlane.xlu2 %560 }
 0x372   :  { %v562_v9 = vsub.f32 %v555_v43, %v561_v8  ;;  %v518_v43 = vsel %vm341_vm1, %v510_v17, 0 }
 0x373   :  { %526 = vmatpush.bf16.xpose.msra.mxu3 %v518_v43 }
 0x374   :  { %v563_v10 = vmul.f32 1.442695, %v562_v9 }
 0x376   :  { %1200 = vpow2.f32 %v563_v10 }
 0x379   :  { %v350_v36 = vpop.xlane.xlu2 %349 }
 0x37a   :  { %1202 = vrcp.f32 %v350_v36 }
 0x37b   :  { %527 = vmatpush.bf16.xpose.msra.mxu3 %v515_v29 }
 0x37c   :  { %v1201_v16 = vpop.eup %1200 }
 0x37d   :  { %v565_v20 = vsel %vm341_vm1, %v1201_v16, 0.0 }
 0x37e   :  { %566 = vadd.xlane.f32.xlu1 %v565_v20 }
 0x380   :  { %v1203_v24 = vpop.eup %1202 }
 0x381   :  { %v352_v25 = vmul.f32 %v1203_v24, %v350_v36 }
 0x383   :  { %v353_v27 = vsub.f32 2.0, %v352_v25  ;;  %v1497_v25 = vld [vmem:[%s1541_s3] ss:$0 sm:$0xff]  ;;  %s1250_s3 = smov [#allocation2]  }
 0x384   :  { %s1045_s24 = sshll.u32 %s1250_s3, 4  ;;  %s1046_s24 = int_to_ptr.vmem [resolvable:$true] %s1045_s24 }
 0x385   :  { %v354_v28 = vmul.f32 %v1203_v24, %v353_v27  ;;  %v1501_v27 = vpop.f32.mrf.mxu2 }
 0x387   :  { %v355_v30 = vmul.f32 %v1438_v19, %v354_v28  ;;  %v582_v19 = vpack.c.b16 %v579_v51, %v578_v50 }
 0x389   :  { %v356_v32 = vpack.c.bf16 %v355_v30, %v355_v30  ;;  %v588_v53 = vsel %vm341_vm1, %v582_v19, 0 }
 0x38b   :  { %1142 = vmatmul.msk.bf16.vlgmr.msrb.gmra.mxu3 %vm341_vm1, %v356_v32 }
 0x38c   :  { %599 = vmatpush.bf16.xpose.msrb.mxu3 %v591_v52 }
 0x394   :  { %600 = vmatpush.bf16.xpose.msrb.mxu3 %v588_v53 }
 0x3af   :  { %v769_v55 = vpop.f32.mrf.mxu0 }
 0x3b0   :  { %v773_v56 = vsel %vm341_vm1, %v769_v55, -inf }
 0x3b1   :  { %774 = vmax.xlane.f32.xlu1 %v773_v56 }
 0x3b7   :  { %v771_v57 = vpop.f32.mrf.mxu0 }
 0x3cf   :  { %v809_v58 = vpop.f32.mrf.mxu1 }
 0x3d0   :  { %v813_v59 = vsel %vm341_vm1, %v809_v58, -inf }
 0x3d1   :  { %814 = vmax.xlane.f32.xlu2 %v813_v59 }
 0x3d7   :  { %v811_v60 = vpop.f32.mrf.mxu1 }
 0x3e1   :  { %v494_v61 = vpop.xlane.xlu0 %493 }
 0x3e2   :  { %1204 = vrcp.f32 %v494_v61 }
 0x3e8   :  { %v1205_v62 = vpop.eup %1204 }
 0x3e9   :  { %v496_v63 = vmul.f32 %v1205_v62, %v494_v61 }
 0x3eb   :  { %v497_v2 = vsub.f32 2.0, %v496_v63 }
 0x3ed   :  { %v498_v7 = vmul.f32 %v1205_v62, %v497_v2 }
 0x3ef   :  { %v499_v8 = vmul.f32 %v1455_v0, %v498_v7 }
 0x3f1   :  { %v500_v9 = vpack.c.bf16 %v499_v8, %v499_v8  ;;  %v567_v10 = vpop.xlane.xlu1 %566 }
 0x3f2   :  { %1206 = vrcp.f32 %v567_v10 }
 0x3f3   :  { %1144 = vmatmul.msk.bf16.vlgmr.msra.gmra.mxu3 %vm341_vm1, %v500_v9 }
 0x3f4   :  { %674 = vmatpush.bf16.xpose.msra.mxu3 %v1392_v14 }
 0x3f8   :  { %v1207_v11 = vpop.eup %1206 }
 0x3f9   :  { %v569_v12 = vmul.f32 %v1207_v11, %v567_v10 }
 0x3fb   :  { %v570_v3 = vsub.f32 2.0, %v569_v12 }
 0x3fd   :  { %v571_v5 = vmul.f32 %v1207_v11, %v570_v3 }
 0x3ff   :  { %v572_v36 = vmul.f32 %v1201_v16, %v571_v5 }
 0x401   :  { %v573_v4 = vpack.c.bf16 %v572_v36, %v572_v36 }
 0x403   :  { %1146 = vmatmul.msk.bf16.vlgmr.msrb.gmra.mxu3 %vm341_vm1, %v573_v4 }
 0x40e   :  { %v457_v38 = vpop.f32.mrf.mxu3 }
 0x40f   :  { %v458_v23 = vadd.f32 %v457_v38, %v1411_v54  ;;  %v1503_v54 = vpop.f32.mrf.mxu2 }
 0x413   :  { %1156 = vmatmul.msk.bf16.vlgmr.msra.gmra.mxu3 %vm94_vm0, %v1320_v35 }
 0x416   :  { %v459_v0 = vpop.f32.mrf.mxu3 }
 0x423   :  { %1157 = vmatmul.msk.bf16.gmra.mxu3 %vm94_vm0, %v1334_v37 }
 0x424   :  { %v775_v15 = vpop.xlane.xlu1 %774 }
 0x425   :  { %v776_v17 = vsub.f32 %v769_v55, %v775_v15 }
 0x427   :  { %v777_v14 = vmul.f32 1.442695, %v776_v17 }
 0x429   :  { %1208 = vpow2.f32 %v777_v14 }
 0x42f   :  { %v1209_v20 = vpop.eup %1208 }
 0x430   :  { %v779_v16 = vsel %vm341_vm1, %v1209_v20, 0.0 }
 0x431   :  { %780 = vadd.xlane.f32.xlu1 %v779_v16 }
 0x433   :  { %1158 = vmatmul.msk.bf16.gmra.mxu3 %vm94_vm0, %v1349_v41 }
 0x443   :  { %1159 = vmatmul.msk.bf16.gmra.mxu3 %vm94_vm0, %v1363_v44 }
 0x444   :  { %v815_v21 = vpop.xlane.xlu2 %814 }
 0x445   :  { %v816_v35 = vsub.f32 %v809_v58, %v815_v21 }
 0x447   :  { %v817_v45 = vmul.f32 1.442695, %v816_v35 }
 0x449   :  { %1210 = vpow2.f32 %v817_v45  ;;  %v724_v45 = vpack.c.bf16 %v1501_v27, %v1501_v27 }
 0x44f   :  { %v1481_v43 = vpop.eup %1210 }
 0x450   :  { %v819_v37 = vsel %vm341_vm1, %v1481_v43, 0.0 }
 0x451   :  { %820 = vadd.xlane.f32.xlu0 %v819_v37 }
 0x453   :  { %1160 = vmatmul.msk.bf16.gmra.mxu3 %vm94_vm0, %v1416_v1 }
 0x463   :  { %1161 = vmatmul.msk.bf16.gmra.mxu3 %vm94_vm0, %v1426_v6 }
 0x473   :  { %1162 = vmatmul.msk.bf16.gmra.mxu3 %vm94_vm0, %v1436_v18 }
 0x476   :  { %v529_v41 = vpop.f32.mrf.mxu3 }
 0x477   :  { %v533_v24 = vadd.f32 %v529_v41, %v458_v23  ;;  %v725_v41 = vpack.c.bf16 %v1503_v54, %v1503_v54 }
 0x47e   :  { %v531_v44 = vpop.f32.mrf.mxu3 }
 0x483   :  { %1163 = vmatmul.msk.bf16.gmra.mxu3 %vm94_vm0, %v1447_v22  ;;  %v652_v22 = vpop.f32.mrf.mxu2 }
 0x484   :  { %v726_v17 = vpack.c.bf16 %v652_v22, %v652_v22 }
 0x486   :  { %v602_v1 = vpop.f32.mrf.mxu3  ;;  %v898_v44 = vunpack.c.l.b16 %v726_v17 }
 0x487   :  { %v606_v26 = vadd.f32 %v602_v1, %v533_v24 }
 0x489   :  { %v610_v6 = vadd.f32 %v1497_v25, %v606_v26 }
 0x48b   :  { %611 = vst.msk [vmem:[#allocation2] sm:$0xff] %vm94_vm0, %v610_v6  ;;  %v654_v34 = vpop.f32.mrf.mxu2  ;;  %v896_v6 = vunpack.c.l.b16 %v724_v45 }
 0x48e   :  { %v604_v18 = vpop.f32.mrf.mxu3 }
 0x48f   :  { %v897_v18 = vunpack.c.l.b16 %v725_v41 }
 0x493   :  { %v657_v53 = vpop.f32.mrf.mxu2 }
 0x494   :  { %v728_v27 = vpack.c.bf16 %v657_v53, %v657_v53 }
 0x496   :  { %v676_v28 = vpop.f32.mrf.mxu3 }
 0x497   :  { %v732_v46 = vpack.c.bf16 %v676_v28, %v676_v28 }
 0x499   :  { %v864_v52 = vunpack.c.l.b16 %v732_v46 }
 0x49b   :  { %v659_v62 = vpop.f32.mrf.mxu2 }
 0x49e   :  { %v678_v29 = vpop.f32.mrf.mxu3 }
 0x49f   :  { %v733_v39 = vpack.c.bf16 %v678_v29, %v678_v29 }
 0x4a1   :  { %v865_v49 = vunpack.c.l.b16 %v733_v39  ;;  %v969_v39 = vunpack.c.l.b16 %v728_v27 }
 0x4a3   :  { %v868_v19 = vpack.c.b16 %v865_v49, %v864_v52  ;;  %v662_v9 = vpop.f32.mrf.mxu2 }
 0x4a4   :  { %v781_v48 = vpop.xlane.xlu1 %780  ;;  %v730_v24 = vpack.c.bf16 %v662_v9, %v662_v9 }
 0x4a5   :  { %1212 = vrcp.f32 %v781_v48  ;;  %v874_v57 = vsel %vm341_vm1, %v868_v19, 0 }
 0x4a6   :  { %v681_v30 = vpop.f32.mrf.mxu3  ;;  %v971_v22 = vunpack.c.l.b16 %v730_v24 }
 0x4a7   :  { %v734_v31 = vpack.c.bf16 %v681_v30, %v681_v30 }
 0x4a9   :  { %v866_v40 = vunpack.c.l.b16 %v734_v31 }
 0x4ab   :  { %v1213_v55 = vpop.eup %1212  ;;  %v664_v35 = vpop.f32.mrf.mxu2 }
 0x4ac   :  { %v783_v56 = vmul.f32 %v1213_v55, %v781_v48  ;;  %v731_v1 = vpack.c.bf16 %v664_v35, %v664_v35 }
 0x4ae   :  { %v683_v32 = vpop.f32.mrf.mxu3  ;;  %v784_v59 = vsub.f32 2.0, %v783_v56  ;;  %v972_v30 = vunpack.c.l.b16 %v731_v1 }
 0x4af   :  { %v735_v33 = vpack.c.bf16 %v683_v32, %v683_v32  ;;  %v729_v32 = vpack.c.bf16 %v659_v62, %v659_v62 }
 0x4b0   :  { %v785_v60 = vmul.f32 %v1213_v55, %v784_v59  ;;  %v974_v54 = vpack.c.b16 %v972_v30, %v971_v22 }
 0x4b1   :  { %v867_v42 = vunpack.c.l.b16 %v735_v33  ;;  %v900_v33 = vpack.c.b16 %v897_v18, %v896_v6 }
 0x4b2   :  { %v786_v61 = vmul.f32 %v1209_v20, %v785_v60  ;;  %v727_v20 = vpack.c.bf16 %v654_v34, %v654_v34 }
 0x4b3   :  { %v869_v47 = vpack.c.b16 %v867_v42, %v866_v40  ;;  %v970_v40 = vunpack.c.l.b16 %v729_v32 }
 0x4b4   :  { %v787_v63 = vpack.c.bf16 %v786_v61, %v786_v61  ;;  %v899_v23 = vunpack.c.l.b16 %v727_v20 }
 0x4b5   :  { %v877_v50 = vsel %vm341_vm1, %v869_v47, 0  ;;  %v973_v42 = vpack.c.b16 %v970_v40, %v969_v39 }
 0x4b6   :  { %v686_v51 = vpop.f32.mrf.mxu3  ;;  %885 = vmatpush.bf16.xpose.msra.mxu1 %v877_v50  ;;  %v901_v28 = vpack.c.b16 %v899_v23, %v898_v44 }
 0x4b7   :  { %v736_v4 = vpack.c.bf16 %v686_v51, %v686_v51 }
 0x4b9   :  { %v832_v16 = vunpack.c.l.b16 %v736_v4 }
 0x4be   :  { %v688_v58 = vpop.f32.mrf.mxu3  ;;  %886 = vmatpush.bf16.xpose.msra.mxu1 %v874_v57 }
 0x4bf   :  { %v737_v3 = vpack.c.bf16 %v688_v58, %v688_v58 }
 0x4c1   :  { %v833_v15 = vunpack.c.l.b16 %v737_v3 }
 0x4c3   :  { %v836_v37 = vpack.c.b16 %v833_v15, %v832_v16 }
 0x4c4   :  { %v821_v7 = vpop.xlane.xlu0 %820 }
 0x4c5   :  { %1167 = vmatmul.msk.bf16.vlgmr.msra.gmra.mxu1 %vm341_vm1, %v787_v63  ;;  %1214 = vrcp.f32 %v821_v7  ;;  %v842_v29 = vsel %vm341_vm1, %v836_v37, 0 }
 0x4c6   :  { %v691_v2 = vpop.f32.mrf.mxu3 }
 0x4c7   :  { %v738_v8 = vpack.c.bf16 %v691_v2, %v691_v2 }
 0x4c9   :  { %v834_v5 = vunpack.c.l.b16 %v738_v8 }
 0x4cb   :  { %v1215_v12 = vpop.eup %1214 }
 0x4cc   :  { %v823_v38 = vmul.f32 %v1215_v12, %v821_v7 }
 0x4ce   :  { %v693_v10 = vpop.f32.mrf.mxu3  ;;  %v824_v21 = vsub.f32 2.0, %v823_v38 }
 0x4cf   :  { %v739_v11 = vpack.c.bf16 %v693_v10, %v693_v10 }
 0x4d0   :  { %v825_v26 = vmul.f32 %v1215_v12, %v824_v21 }
 0x4d1   :  { %v835_v36 = vunpack.c.l.b16 %v739_v11 }
 0x4d2   :  { %v826_v31 = vmul.f32 %v1481_v43, %v825_v26 }
 0x4d3   :  { %v837_v0 = vpack.c.b16 %v835_v36, %v834_v5 }
 0x4d4   :  { %v827_v34 = vpack.c.bf16 %v826_v31, %v826_v31 }
 0x4d5   :  { %v845_v14 = vsel %vm341_vm1, %v837_v0, 0 }
 0x4d6   :  { %853 = vmatpush.bf16.xpose.msra.mxu0 %v845_v14 }
 0x4de   :  { %854 = vmatpush.bf16.xpose.msra.mxu0 %v842_v29 }
 0x4e5   :  { %1166 = vmatmul.msk.bf16.vlgmr.msra.gmra.mxu0 %vm341_vm1, %v827_v34 }
 0x4e6   :  { %910 = vmatpush.bf16.msrb.mxu0 %v901_v28 }
 0x4ea   :  { %911 = vmatpush.bf16.msrb.mxu0 %v900_v33 }
 0x4ee   :  { %983 = vmatpush.bf16.msra.mxu0 %v974_v54 }
 0x4f2   :  { %984 = vmatpush.bf16.msra.mxu0 %v973_v42 }
 0x4f5   :  { %1168 = vmatmul.msk.bf16.vlgmr.msrb.gmra.mxu0 %vm94_vm0, %v1388_v13 }
 0x505   :  { %1170 = vmatmul.msk.bf16.vlgmr.msra.gmra.mxu0 %vm94_vm0, %v1388_v13  ;;  %v696_v13 = vpop.f32.mrf.mxu3 }
 0x506   :  { %v740_v36 = vpack.c.bf16 %v696_v13, %v696_v13 }
 0x508   :  { %v936_v15 = vunpack.c.l.b16 %v740_v36 }
 0x50d   :  { %v698_v62 = vpop.f32.mrf.mxu3 }
 0x50e   :  { %v741_v4 = vpack.c.bf16 %v698_v62, %v698_v62 }
 0x510   :  { %v937_v17 = vunpack.c.l.b16 %v741_v4 }
 0x512   :  { %v940_v20 = vpack.c.b16 %v937_v17, %v936_v15 }
 0x514   :  { %v946_v21 = vsel %vm341_vm1, %v940_v20, 0 }
 0x515   :  { %v701_v7 = vpop.f32.mrf.mxu3 }
 0x516   :  { %v742_v11 = vpack.c.bf16 %v701_v7, %v701_v7 }
 0x518   :  { %v938_v3 = vunpack.c.l.b16 %v742_v11 }
 0x51d   :  { %v703_v10 = vpop.f32.mrf.mxu3 }
 0x51e   :  { %v743_v12 = vpack.c.bf16 %v703_v10, %v703_v10 }
 0x520   :  { %v939_v5 = vunpack.c.l.b16 %v743_v12 }
 0x522   :  { %v941_v38 = vpack.c.b16 %v939_v5, %v938_v3 }
 0x524   :  { %v949_v14 = vsel %vm341_vm1, %v941_v38, 0 }
 0x525   :  { %v706_v0 = vpop.f32.mrf.mxu3  ;;  %957 = vmatpush.bf16.xpose.msrb.mxu1 %v949_v14 }
 0x526   :  { %v744_v44 = vpack.c.bf16 %v706_v0, %v706_v0 }
 0x528   :  { %v1009_v6 = vunpack.c.l.b16 %v744_v44 }
 0x52d   :  { %v708_v16 = vpop.f32.mrf.mxu3  ;;  %958 = vmatpush.bf16.xpose.msrb.mxu1 %v946_v21 }
 0x52e   :  { %v745_v23 = vpack.c.bf16 %v708_v16, %v708_v16 }
 0x530   :  { %v1010_v18 = vunpack.c.l.b16 %v745_v23 }
 0x532   :  { %v1013_v29 = vpack.c.b16 %v1010_v18, %v1009_v6 }
 0x534   :  { %v1019_v22 = vsel %vm341_vm1, %v1013_v29, 0 }
 0x535   :  { %v711_v35 = vpop.f32.mrf.mxu3 }
 0x536   :  { %v746_v37 = vpack.c.bf16 %v711_v35, %v711_v35 }
 0x538   :  { %v1011_v24 = vunpack.c.l.b16 %v746_v37 }
 0x53d   :  { %v713_v45 = vpop.f32.mrf.mxu3 }
 0x53e   :  { %v747_v41 = vpack.c.bf16 %v713_v45, %v713_v45 }
 0x540   :  { %v1012_v1 = vunpack.c.l.b16 %v747_v41 }
 0x542   :  { %v888_v43 = vpop.f32.mrf.mxu1  ;;  %v1014_v26 = vpack.c.b16 %v1012_v1, %v1011_v24 }
 0x544   :  { %v1022_v28 = vsel %vm341_vm1, %v1014_v26, 0 }
 0x545   :  { %1030 = vmatpush.bf16.xpose.msra.mxu1 %v1022_v28 }
 0x54a   :  { %v890_v46 = vpop.f32.mrf.mxu1 }
 0x54d   :  { %1031 = vmatpush.bf16.xpose.msra.mxu1 %v1019_v22 }
 0x562   :  { %v856_v47 = vpop.f32.mrf.mxu0 }
 0x563   :  { %v1520_v48 = vadd.f32 %v888_v43, %v856_v47 }
 0x56a   :  { %v858_v49 = vpop.f32.mrf.mxu0 }
 0x572   :  { %v913_v50 = vpop.f32.mrf.mxu0 }
 0x573   :  { %v917_v51 = vsel %vm341_vm1, %v913_v50, -inf }
 0x574   :  { %918 = vmax.xlane.f32.xlu2 %v917_v51 }
 0x57a   :  { %v915_v52 = vpop.f32.mrf.mxu0 }
 0x582   :  { %v986_v19 = vpop.f32.mrf.mxu0 }
 0x583   :  { %v990_v53 = vsel %vm341_vm1, %v986_v19, -inf }
 0x584   :  { %991 = vmax.xlane.f32.xlu0 %v990_v53 }
 0x58a   :  { %v988_v55 = vpop.f32.mrf.mxu0 }
 0x5e7   :  { %v919_v56 = vpop.xlane.xlu2 %918 }
 0x5e8   :  { %v920_v57 = vsub.f32 %v913_v50, %v919_v56 }
 0x5ea   :  { %v921_v58 = vmul.f32 1.442695, %v920_v57 }
 0x5ec   :  { %1216 = vpow2.f32 %v921_v58 }
 0x5f2   :  { %v1217_v59 = vpop.eup %1216 }
 0x5f3   :  { %v923_v60 = vsel %vm341_vm1, %v1217_v59, 0.0 }
 0x5f4   :  { %924 = vadd.xlane.f32.xlu2 %v923_v60 }
 0x5f7   :  { %v992_v61 = vpop.xlane.xlu0 %991 }
 0x5f8   :  { %v993_v63 = vsub.f32 %v986_v19, %v992_v61 }
 0x5fa   :  { %v994_v2 = vmul.f32 1.442695, %v993_v63 }
 0x5fc   :  { %1218 = vpow2.f32 %v994_v2 }
 0x602   :  { %v1219_v8 = vpop.eup %1218 }
 0x603   :  { %v996_v9 = vsel %vm341_vm1, %v1219_v8, 0.0 }
 0x604   :  { %997 = vadd.xlane.f32.xlu0 %v996_v9 }
 0x667   :  { %v925_v30 = vpop.xlane.xlu2 %924 }
 0x668   :  { %1220 = vrcp.f32 %v925_v30 }
 0x66e   :  { %v1221_v31 = vpop.eup %1220 }
 0x66f   :  { %v927_v27 = vmul.f32 %v1221_v31, %v925_v30 }
 0x671   :  { %v928_v32 = vsub.f32 2.0, %v927_v27 }
 0x673   :  { %v929_v33 = vmul.f32 %v1221_v31, %v928_v32 }
 0x675   :  { %v930_v54 = vmul.f32 %v1217_v59, %v929_v33 }
 0x677   :  { %v931_v34 = vpack.c.bf16 %v930_v54, %v930_v54  ;;  %v998_v39 = vpop.xlane.xlu0 %997 }
 0x678   :  { %1222 = vrcp.f32 %v998_v39 }
 0x679   :  { %1169 = vmatmul.msk.bf16.vlgmr.msrb.gmra.mxu1 %vm341_vm1, %v931_v34 }
 0x67e   :  { %v1223_v40 = vpop.eup %1222 }
 0x67f   :  { %v1000_v42 = vmul.f32 %v1223_v40, %v998_v39 }
 0x681   :  { %v1001_v43 = vsub.f32 2.0, %v1000_v42 }
 0x683   :  { %v1002_v46 = vmul.f32 %v1223_v40, %v1001_v43 }
 0x685   :  { %v1003_v47 = vmul.f32 %v1219_v8, %v1002_v46 }
 0x687   :  { %v1004_v49 = vpack.c.bf16 %v1003_v47, %v1003_v47 }
 0x689   :  { %1171 = vmatmul.msk.bf16.vlgmr.msra.gmra.mxu1 %vm341_vm1, %v1004_v49 }
 0x6f6   :  { %v960_v50 = vpop.f32.mrf.mxu1 }
 0x6f7   :  { %v964_v52 = vadd.f32 %v960_v50, %v1520_v48 }
 0x6fe   :  { %v962_v51 = vpop.f32.mrf.mxu1 }
 0x706   :  { %v1033_v19 = vpop.f32.mrf.mxu1 }
 0x707   :  { %v1037_v53 = vadd.f32 %v1033_v19, %v964_v52 }
 0x709   :  { %v1038_v55 = vadd.f32 %v1497_v25, %v1037_v53 }
 0x70b   :  { %1040 = vst.msk [vmem:[#allocation2 + $0x8] sm:$0xff] %vm94_vm0, %v1038_v55 }
 0x70c   :  { %1053 = dma.vmem_to_hbm [thread:$0]  %s1046_s24, 256, %s1048_s27, [#allocation3], %s1251_s28, %s1251_s28, %s1252_s29  }
 0x70e   :  { %v1035_v56 = vpop.f32.mrf.mxu1 }
 0x70f   :  { %1248 = dma.done.wait [#allocation3], 256  }
 0x710   :  { %1249 = vsyncadd [#allocation3], 4294967040 }
 0x711   :  { %1058 = vsyncpa [#allocation3], 1 }

</bundles_post_ra>
